<compile_context>
chip_gen: v7x
topology: tpu7x:2x2x1
jax: 0.10.0
libtpu: 0.0.40
codegen_flags: <defaults>
</compile_context>

<pallas_src>
import math

import jax
import jax.numpy as jnp
from jax.experimental import pallas as pl
from jax.experimental.pallas import tpu as pltpu


def _mixer_dma_kernel(a_hbm, o_hbm, sem):
    # Single whole-array HBM->HBM DMA: A (S, S) -> out[0] (S, S).
    cp = pltpu.make_async_copy(a_hbm, o_hbm.at[0], sem)
    cp.start()
    cp.wait()


def linear_mixer_forward(A, x_sem, x_pos):
    """Pallas implementation of LinearMixer.forward.

    A:      (seq_len, seq_len) parameter
    x_sem:  (batch, seq_len, model_dim)  -- unused by the reference forward
    x_pos:  (batch, seq_len, model_dim)  -- unused by the reference forward
    returns (1, seq_len, seq_len)
    """
    del x_sem, x_pos  # the reference forward ignores its inputs
    seq_len = A.shape[0]
    itemsize = jnp.dtype(A.dtype).itemsize

    return pl.pallas_call(
        _mixer_dma_kernel,
        out_shape=jax.ShapeDtypeStruct((1, seq_len, seq_len), A.dtype),
        # No grid: the body runs once and issues one DMA for the whole array.
        in_specs=[pl.BlockSpec(memory_space=pl.ANY)],
        out_specs=pl.BlockSpec(memory_space=pl.ANY),
        scratch_shapes=[pltpu.SemaphoreType.DMA],
        compiler_params=pltpu.CompilerParams(has_side_effects=True),
        # Advisory hint for XLA's scheduler: zero-flop, bandwidth-only op.
        cost_estimate=pl.CostEstimate(
            flops=0,
            transcendentals=0,
            bytes_accessed=2 * seq_len * seq_len * itemsize,
        ),
    )(A)


def init_linear_mixer_params(key, model_dim, seq_len, dtype=jnp.float32):
    """Deterministic re-implementation of nn.init.kaiming_uniform_(A.T, a=sqrt(5)).

    For A.T of shape (seq_len, seq_len): fan_in = seq_len,
    gain = sqrt(2 / (1 + a^2)) = sqrt(1/3),
    bound = gain * sqrt(3 / fan_in) = 1 / sqrt(seq_len).
    """
    del model_dim  # A only depends on seq_len
    bound = 1.0 / math.sqrt(seq_len)
    A_T = jax.random.uniform(
        key, (seq_len, seq_len), dtype=dtype, minval=-bound, maxval=bound
    )
    return A_T.T  # in-place init was applied to A.T; A is its transpose


if __name__ == "__main__":
    batch = 2
    model_dim = 32
    seq_len = 8

    key = jax.random.PRNGKey(0)
    k_a, k_sem, k_pos = jax.random.split(key, 3)

    A = init_linear_mixer_params(k_a, model_dim, seq_len)
    x_sem = jax.random.normal(k_sem, (batch, seq_len, model_dim), dtype=jnp.float32)
    x_pos = jax.random.normal(k_pos, (batch, seq_len, model_dim), dtype=jnp.float32)

    out = linear_mixer_forward(A, x_sem, x_pos)
    out = jax.block_until_ready(out)

    assert out.shape == (1, seq_len, seq_len), out.shape
    assert out.dtype == jnp.float32
    assert bool(jnp.allclose(out[0], A)), "kernel output does not match parameter A"

    print("KERNEL_OK")
</pallas_src>

<mosaic_0001>
module attributes {stable_mosaic.version = 11 : i64} {
  func.func @_mixer_dma_kernel(%arg0: memref<8x8xf32, #tpu.memory_space<any>>, %arg1: memref<1x8x8xf32, #tpu.memory_space<any>>, %arg2: memref<!tpu.dma_semaphore, #tpu.memory_space<semaphore_mem>>) attributes {dimension_semantics = [], scalar_prefetch = 0 : i64, scratch_operands = 1 : i64, tpu.core_type = #tpu.core_type<tc>} {
    %c0_i32 = arith.constant 0 : i32
    %c0_i32_0 = arith.constant 0 : i32
    %c0_i32_1 = arith.constant 0 : i32
    %0 = tpu.memref_slice %arg1[%c0_i32, %c0_i32_0, %c0_i32_1] : memref<1x8x8xf32, #tpu.memory_space<any>> -> memref<1x8x8xf32, #tpu.memory_space<any>>
    %1 = tpu.memref_squeeze %0 : memref<1x8x8xf32, #tpu.memory_space<any>> -> memref<8x8xf32, #tpu.memory_space<any>>
    tpu.enqueue_dma source(%arg0 : memref<8x8xf32, #tpu.memory_space<any>>) target(%1 : memref<8x8xf32, #tpu.memory_space<any>>) target_semaphore(%arg2 : memref<!tpu.dma_semaphore, #tpu.memory_space<semaphore_mem>>)
    %c0_i32_2 = arith.constant 0 : i32
    %c0_i32_3 = arith.constant 0 : i32
    %c0_i32_4 = arith.constant 0 : i32
    %2 = tpu.memref_slice %arg1[%c0_i32_2, %c0_i32_3, %c0_i32_4] : memref<1x8x8xf32, #tpu.memory_space<any>> -> memref<1x8x8xf32, #tpu.memory_space<any>>
    %3 = tpu.memref_squeeze %2 : memref<1x8x8xf32, #tpu.memory_space<any>> -> memref<8x8xf32, #tpu.memory_space<any>>
    tpu.wait_dma2 semaphore(%arg2 : memref<!tpu.dma_semaphore, #tpu.memory_space<semaphore_mem>>) src(%arg0 : memref<8x8xf32, #tpu.memory_space<any>>) dst(%3 : memref<8x8xf32, #tpu.memory_space<any>>)
    return
  }
}

</mosaic_0001>

<bundles_post_ra>
// kernel: tpu_custom_call.1
= control target key start
LH: loop header
LB: loop body
LE: loop exit
PB: predicated region body
PF: predicated region fallthrough
CT: control target
= control target key end

     0   :  { %s34_s6 = smov [#allocation2]   ;;  %s35_s7 = smov [#allocation3]   ;;  %s53_s0 = inlined_call_operand.hbm [shape: f32[8,8], index: 0, kind: input, shape index: {}]   ;;  %s54_s1 = inlined_call_operand.hbm [shape: f32[1,8,8], index: 1, kind: output, shape index: {}]  }
   0x1   :  { %s36_s8 = smov 0  }
   0x2   :  { %18 = dma.general %s53_s0, 128, %s54_s1, %s34_s6, %s35_s7, [#allocation4], %s36_s8, 0  }
   0x3   :  { %32 = dma.done.wait [#allocation2], 128 }
   0x4   :  { %33 = vsyncadd [#allocation2], 4294967168 }
   0x5   :  { %22 = vsyncmov [#allocation2] }
   0x8   :  { %s23_s13 = vpop.sfrf %22 }
   0x9   :  { %p28_p0 = scmp.ne.s32.totalorder %s23_s13, 0 }
   0xb   :  { %27 = shalt.err (%p28_p0)  }

</bundles_post_ra>
